<compile_context>
chip_gen: v5e
topology: v5e:2x2
jax: 0.10.0
libtpu: 0.0.40
codegen_flags: <defaults>
</compile_context>

<pallas_src>
import functools
import math

import jax
import jax.numpy as jnp
from jax import lax
from jax.experimental import pallas as pl
from jax.experimental.pallas import tpu as pltpu


# ---------------------------------------------------------------------------
# Kernel A: h = LayerNorm(gelu(x @ Wd^T + bd)) * gamma + beta   -> bf16
# ---------------------------------------------------------------------------
def _transform_kernel(x_ref, wd_ref, bd_ref, g_ref, b_ref, h_ref, *, eps):
    # bf16 operands feed the MXU at native rate; accumulation stays f32.
    xb = x_ref[...].astype(jnp.bfloat16)                       # (tm, H)
    h = jnp.dot(xb, wd_ref[...], preferred_element_type=jnp.float32)
    h = h + bd_ref[...]                                        # (1, H) f32 broadcast
    # exact GELU (HF ACT2FN["gelu"]): 0.5 * x * (1 + erf(x / sqrt(2)))
    h = 0.5 * h * (1.0 + lax.erf(h * jnp.float32(1.0 / math.sqrt(2.0))))
    # LayerNorm over the hidden axis (f32 statistics)
    mean = jnp.mean(h, axis=-1, keepdims=True)
    var = jnp.mean(jnp.square(h - mean), axis=-1, keepdims=True)
    h = (h - mean) * lax.rsqrt(var + jnp.float32(eps))
    h = h * g_ref[...] + b_ref[...]
    h_ref[...] = h.astype(h_ref.dtype)                          # bf16 for the MXU


# ---------------------------------------------------------------------------
# Kernel B: logits = h @ E^T + bias   (E^T presented as (H, tv) bf16 slabs)
# ---------------------------------------------------------------------------
def _vocab_kernel(h_ref, et_ref, bias_ref, out_ref):
    logits = jnp.dot(h_ref[...], et_ref[...],
                     preferred_element_type=jnp.float32)        # (tm, tv) f32 acc
    out_ref[...] = (logits + bias_ref[...]).astype(out_ref.dtype)


def prepare_decoder_matrix(embedding_weight, dtype=jnp.bfloat16):
    """One-time transpose+cast of the (V, H) embedding to MXU-native (H, V).

    Cache the result across forward calls (the weight is static) so the
    per-call HBM traffic is only the kernel's own embedding stream.
    """
    return jnp.asarray(embedding_weight).T.astype(dtype)


def deberta_v2_lm_prediction_head(hidden_states, embedding_weight,
                                  dense_w, dense_b, ln_gamma, ln_beta, bias,
                                  *, eps=1e-7, tm=1024, tv=512,
                                  emb_t=None, logits_dtype=None):
    """hidden_states: (B, S, H), embedding_weight: (V, H)  ->  (B, S, V).

    emb_t: optional pre-computed prepare_decoder_matrix(embedding_weight).
    logits_dtype: output dtype (default hidden_states.dtype; bf16 halves the
    logits writeback stream if downstream numerics allow).
    """
    B, S, H = hidden_states.shape
    V, H2 = embedding_weight.shape
    assert H == H2
    M = B * S
    out_dtype = jnp.dtype(logits_dtype if logits_dtype is not None
                          else hidden_states.dtype)

    # Clamp tiles: full-dim blocks are always legal; otherwise keep the
    # (multiple-of-128 / multiple-of-8) defaults and let Pallas mask edge blocks.
    tm_eff = M if M <= tm else tm
    tv_eff = V if V <= tv else tv
    gm = pl.cdiv(M, tm_eff)
    gv = pl.cdiv(V, tv_eff)

    x = hidden_states.reshape(M, H)                      # native dtype, no copy
    wd_t = dense_w.T.astype(jnp.bfloat16)                # (in, out) for the MXU
    bd2 = dense_b.reshape(1, H).astype(jnp.float32)
    g2 = ln_gamma.reshape(1, H).astype(jnp.float32)
    b2 = ln_beta.reshape(1, H).astype(jnp.float32)
    if emb_t is None:
        emb_t = prepare_decoder_matrix(embedding_weight)  # (H, V) bf16
    bias2 = bias.reshape(1, V).astype(jnp.float32)

    def _vmem_limit(nbytes):
        cap = 64 << 20           # conservative (v7x physical) if query fails
        try:
            cap = int(pltpu.get_tpu_info().vmem_capacity_bytes)
        except Exception:
            pass
        ceiling = max(32 << 20, int(0.8 * cap))           # ~51 MiB v7x, ~102 MiB v5e/v6e
        return int(min(max(int(1.5 * nbytes), 32 << 20), ceiling))

    x_bytes = x.dtype.itemsize
    out_bytes = out_dtype.itemsize

    # ---- Kernel A: dense + GELU + LayerNorm -> bf16 hidden ----
    vmem_a = (2 * tm_eff * H * x_bytes     # x double-buffered (native dtype)
              + 2 * H * H * 2              # dense weight buffers (bf16)
              + 6 * H * 4                  # dense bias, gamma, beta
              + 2 * tm_eff * H * 2)        # bf16 h output buffers

    def _call_transform(single_buffer_w):
        if single_buffer_w:
            # Constant index_map -> single buffer is enough; frees ~H*H*2 bytes.
            w_spec = pl.BlockSpec((H, H), lambda i: (0, 0),
                                  pipeline_mode=pl.Buffered(1))
        else:
            w_spec = pl.BlockSpec((H, H), lambda i: (0, 0))
        return pl.pallas_call(
            functools.partial(_transform_kernel, eps=eps),
            out_shape=jax.ShapeDtypeStruct((M, H), jnp.bfloat16),
            grid_spec=pltpu.PrefetchScalarGridSpec(
                num_scalar_prefetch=0,
                grid=(gm,),
                in_specs=[
                    pl.BlockSpec((tm_eff, H), lambda i: (i, 0)),  # tokens
                    w_spec,                                       # dense W^T (bf16)
                    pl.BlockSpec((1, H), lambda i: (0, 0)),       # dense bias
                    pl.BlockSpec((1, H), lambda i: (0, 0)),       # LN gamma
                    pl.BlockSpec((1, H), lambda i: (0, 0)),       # LN beta
                ],
                out_specs=pl.BlockSpec((tm_eff, H), lambda i: (i, 0)),
            ),
            compiler_params=pltpu.CompilerParams(
                dimension_semantics=("parallel",),
                vmem_limit_bytes=_vmem_limit(vmem_a)),
            cost_estimate=pl.CostEstimate(
                flops=2 * M * H * H + 10 * M * H,
                transcendentals=2 * M * H,
                bytes_accessed=M * H * x_bytes + H * H * 2 + M * H * 2),
        )(x, wd_t, bd2, g2, b2)

    try:
        h = _call_transform(True)      # single-buffered constant weight
    except Exception:
        h = _call_transform(False)     # fallback: default double-buffering

    # ---- Kernel B: vocab projection ----
    vmem_b = (2 * tm_eff * H * 2             # h buffers (bf16)
              + 2 * H * tv_eff * 2           # embedding slabs (bf16)
              + 2 * 8 * tv_eff * 4           # bias slabs
              + 2 * tm_eff * tv_eff * out_bytes)   # output slabs
    out = pl.pallas_call(
        _vocab_kernel,
        out_shape=jax.ShapeDtypeStruct((M, V), out_dtype),
        grid_spec=pltpu.PrefetchScalarGridSpec(
            num_scalar_prefetch=0,
            grid=(gm, gv),
            in_specs=[
                pl.BlockSpec((tm_eff, H), lambda i, j: (i, 0)),   # h (resident over j)
                pl.BlockSpec((H, tv_eff), lambda i, j: (0, j)),   # E^T slab
                pl.BlockSpec((1, tv_eff), lambda i, j: (0, j)),   # bias slab
            ],
            out_specs=pl.BlockSpec((tm_eff, tv_eff), lambda i, j: (i, j)),
        ),
        compiler_params=pltpu.CompilerParams(
            # No accumulation across either axis -> both legally parallel
            # (lets v7x's 2 TensorCores split the vocab axis when M is small).
            dimension_semantics=("parallel", "parallel"),
            vmem_limit_bytes=_vmem_limit(vmem_b)),
        cost_estimate=pl.CostEstimate(
            flops=2 * M * V * H,
            transcendentals=0,
            bytes_accessed=gm * V * H * 2 + M * H * 2 + M * V * out_bytes),
    )(h, emb_t, bias2)

    return out.reshape(B, S, V)


def _reference(hidden_states, embedding_weight, dense_w, dense_b,
               ln_gamma, ln_beta, bias, eps=1e-7):
    h = hidden_states @ dense_w.T + dense_b
    h = 0.5 * h * (1.0 + lax.erf(h / jnp.sqrt(2.0)))
    mean = jnp.mean(h, axis=-1, keepdims=True)
    var = jnp.mean(jnp.square(h - mean), axis=-1, keepdims=True)
    h = (h - mean) * lax.rsqrt(var + eps)
    h = h * ln_gamma + ln_beta
    return h @ embedding_weight.T + bias


if __name__ == "__main__":
    # Small config consistent with the module: hidden_size=32, vocab_size=256.
    B, S, H, V = 2, 8, 32, 256
    key = jax.random.PRNGKey(0)
    k_x, k_e, k_w, k_b, k_bias = jax.random.split(key, 5)

    hidden_states = jax.random.normal(k_x, (B, S, H), dtype=jnp.float32)
    embedding_weight = jax.random.normal(k_e, (V, H), dtype=jnp.float32) * 0.02
    dense_w = jax.random.normal(k_w, (H, H), dtype=jnp.float32) * 0.02   # (out, in)
    dense_b = jax.random.normal(k_b, (H,), dtype=jnp.float32) * 0.02
    ln_gamma = jnp.ones((H,), dtype=jnp.float32)
    ln_beta = jnp.zeros((H,), dtype=jnp.float32)
    # self.bias is zero-initialized in __init__; forward also accepts an external
    # bias — use a deterministic nonzero one to exercise the add.
    bias = jax.random.normal(k_bias, (V,), dtype=jnp.float32) * 0.02

    # One-time weight prep (cache this across calls in a real model).
    emb_t = prepare_decoder_matrix(embedding_weight)

    logits = deberta_v2_lm_prediction_head(
        hidden_states, embedding_weight, dense_w, dense_b,
        ln_gamma, ln_beta, bias, eps=1e-7, emb_t=emb_t)
    logits = jax.block_until_ready(logits)

    ref = _reference(hidden_states, embedding_weight, dense_w, dense_b,
                     ln_gamma, ln_beta, bias, eps=1e-7)
    assert logits.shape == (B, S, V)
    # bf16 dense / hidden / embedding quantization => loose tolerance
    assert jnp.allclose(logits, ref, atol=3e-2, rtol=3e-2), "mismatch vs reference"

    print("KERNEL_OK")
</pallas_src>

<mosaic_0001>
module attributes {stable_mosaic.version = 11 : i64} {
  func.func @_transform_kernel(%arg0: i32, %arg1: memref<16x32xf32, #tpu.memory_space<vmem>>, %arg2: memref<32x32xbf16, #tpu.memory_space<vmem>>, %arg3: memref<1x32xf32, #tpu.memory_space<vmem>>, %arg4: memref<1x32xf32, #tpu.memory_space<vmem>>, %arg5: memref<1x32xf32, #tpu.memory_space<vmem>>, %arg6: memref<16x32xbf16, #tpu.memory_space<vmem>>) attributes {dimension_semantics = [#tpu.dimension_semantics<parallel>], iteration_bounds = array<i64: 1>, scalar_prefetch = 0 : i64, scratch_operands = 0 : i64, tpu.core_type = #tpu.core_type<tc>, window_params = [{transform_indices = @transform_0, window_bounds = array<i64: 16, 32>}, {pipeline_mode = #tpu.pipeline_mode<synchronous>, transform_indices = @transform_1, window_bounds = array<i64: 32, 32>}, {pipeline_mode = #tpu.pipeline_mode<synchronous>, transform_indices = @transform_2, window_bounds = array<i64: 1, 32>}, {pipeline_mode = #tpu.pipeline_mode<synchronous>, transform_indices = @transform_3, window_bounds = array<i64: 1, 32>}, {pipeline_mode = #tpu.pipeline_mode<synchronous>, transform_indices = @transform_4, window_bounds = array<i64: 1, 32>}, {transform_indices = @transform_5, window_bounds = array<i64: 16, 32>}]} {
    %c0 = arith.constant 0 : index
    %c0_0 = arith.constant 0 : index
    %0 = vector.load %arg1[%c0, %c0_0] : memref<16x32xf32, #tpu.memory_space<vmem>>, vector<16x32xf32>
    %1 = arith.truncf %0 : vector<16x32xf32> to vector<16x32xbf16>
    %c0_1 = arith.constant 0 : index
    %c0_2 = arith.constant 0 : index
    %2 = vector.load %arg2[%c0_1, %c0_2] : memref<32x32xbf16, #tpu.memory_space<vmem>>, vector<32x32xbf16>
    %cst = arith.constant dense<0.000000e+00> : vector<16x32xf32>
    %3 = tpu.matmul %1, %2, %cst {dimension_numbers = #tpu.dot_dimension_numbers<[1], [0], [0], [1], [0, 0, 1, 1], [], []>} : vector<16x32xbf16>, vector<32x32xbf16>, vector<16x32xf32> -> vector<16x32xf32>
    %c0_3 = arith.constant 0 : index
    %c0_4 = arith.constant 0 : index
    %4 = vector.load %arg3[%c0_3, %c0_4] : memref<1x32xf32, #tpu.memory_space<vmem>>, vector<1x32xf32>
    %5 = vector.broadcast %4 : vector<1x32xf32> to vector<16x32xf32>
    %6 = arith.addf %3, %5 : vector<16x32xf32>
    %cst_5 = arith.constant 5.000000e-01 : f32
    %7 = vector.broadcast %cst_5 : f32 to vector<16x32xf32>
    %8 = arith.mulf %7, %6 : vector<16x32xf32>
    %cst_6 = arith.constant 0.707106769 : f32
    %9 = vector.broadcast %cst_6 : f32 to vector<16x32xf32>
    %10 = arith.mulf %6, %9 : vector<16x32xf32>
    %11 = math.erf %10 : vector<16x32xf32>
    %cst_7 = arith.constant 1.000000e+00 : f32
    %12 = vector.broadcast %cst_7 : f32 to vector<16x32xf32>
    %13 = arith.addf %12, %11 : vector<16x32xf32>
    %14 = arith.mulf %8, %13 : vector<16x32xf32>
    %cst_8 = arith.constant dense<0.000000e+00> : vector<16xf32>
    %15 = vector.multi_reduction <add>, %14, %cst_8 [1] : vector<16x32xf32> to vector<16xf32>
    %16 = vector.shape_cast %15 : vector<16xf32> to vector<16x1xf32>
    %cst_9 = arith.constant 3.200000e+01 : f32
    %17 = vector.broadcast %cst_9 : f32 to vector<16x1xf32>
    %18 = arith.divf %16, %17 : vector<16x1xf32>
    %19 = vector.broadcast %18 : vector<16x1xf32> to vector<16x32xf32>
    %20 = arith.subf %14, %19 : vector<16x32xf32>
    %21 = arith.mulf %20, %20 : vector<16x32xf32>
    %cst_10 = arith.constant dense<0.000000e+00> : vector<16xf32>
    %22 = vector.multi_reduction <add>, %21, %cst_10 [1] : vector<16x32xf32> to vector<16xf32>
    %23 = vector.shape_cast %22 : vector<16xf32> to vector<16x1xf32>
    %cst_11 = arith.constant 3.200000e+01 : f32
    %24 = vector.broadcast %cst_11 : f32 to vector<16x1xf32>
    %25 = arith.divf %23, %24 : vector<16x1xf32>
    %26 = vector.broadcast %18 : vector<16x1xf32> to vector<16x32xf32>
    %27 = arith.subf %14, %26 : vector<16x32xf32>
    %cst_12 = arith.constant 1.000000e-07 : f32
    %28 = vector.broadcast %cst_12 : f32 to vector<16x1xf32>
    %29 = arith.addf %25, %28 : vector<16x1xf32>
    %30 = math.rsqrt %29 : vector<16x1xf32>
    %31 = vector.broadcast %30 : vector<16x1xf32> to vector<16x32xf32>
    %32 = arith.mulf %27, %31 : vector<16x32xf32>
    %c0_13 = arith.constant 0 : index
    %c0_14 = arith.constant 0 : index
    %33 = vector.load %arg4[%c0_13, %c0_14] : memref<1x32xf32, #tpu.memory_space<vmem>>, vector<1x32xf32>
    %34 = vector.broadcast %33 : vector<1x32xf32> to vector<16x32xf32>
    %35 = arith.mulf %32, %34 : vector<16x32xf32>
    %c0_15 = arith.constant 0 : index
    %c0_16 = arith.constant 0 : index
    %36 = vector.load %arg5[%c0_15, %c0_16] : memref<1x32xf32, #tpu.memory_space<vmem>>, vector<1x32xf32>
    %37 = vector.broadcast %36 : vector<1x32xf32> to vector<16x32xf32>
    %38 = arith.addf %35, %37 : vector<16x32xf32>
    %39 = arith.truncf %38 : vector<16x32xf32> to vector<16x32xbf16>
    %c0_17 = arith.constant 0 : index
    %c0_18 = arith.constant 0 : index
    %40 = vector.load %arg6[%c0_17, %c0_18] : memref<16x32xbf16, #tpu.memory_space<vmem>>, vector<16x32xbf16>
    tpu.vector_store %arg6[%c0_17, %c0_18], %39 {strides = array<i32>} : memref<16x32xbf16, #tpu.memory_space<vmem>>, vector<16x32xbf16>,
    return
  }
  func.func @transform_0(%arg0: i32) -> (i32, i32) {
    %c0_i32 = arith.constant 0 : i32
    %c0_i32_0 = arith.constant 0 : i32
    return %arg0, %c0_i32 : i32, i32
  }
  func.func @transform_1(%arg0: i32) -> (i32, i32) {
    %c0_i32 = arith.constant 0 : i32
    %c0_i32_0 = arith.constant 0 : i32
    %c0_i32_1 = arith.constant 0 : i32
    return %c0_i32, %c0_i32_0 : i32, i32
  }
  func.func @transform_2(%arg0: i32) -> (i32, i32) {
    %c0_i32 = arith.constant 0 : i32
    %c0_i32_0 = arith.constant 0 : i32
    %c0_i32_1 = arith.constant 0 : i32
    return %c0_i32, %c0_i32_0 : i32, i32
  }
  func.func @transform_3(%arg0: i32) -> (i32, i32) {
    %c0_i32 = arith.constant 0 : i32
    %c0_i32_0 = arith.constant 0 : i32
    %c0_i32_1 = arith.constant 0 : i32
    return %c0_i32, %c0_i32_0 : i32, i32
  }
  func.func @transform_4(%arg0: i32) -> (i32, i32) {
    %c0_i32 = arith.constant 0 : i32
    %c0_i32_0 = arith.constant 0 : i32
    %c0_i32_1 = arith.constant 0 : i32
    return %c0_i32, %c0_i32_0 : i32, i32
  }
  func.func @transform_5(%arg0: i32) -> (i32, i32) {
    %c0_i32 = arith.constant 0 : i32
    %c0_i32_0 = arith.constant 0 : i32
    return %arg0, %c0_i32 : i32, i32
  }
}

module attributes {stable_mosaic.version = 11 : i64} {
  func.func @_transform_kernel(%arg0: i32, %arg1: memref<16x32xf32, #tpu.memory_space<vmem>>, %arg2: memref<32x32xbf16, #tpu.memory_space<vmem>>, %arg3: memref<1x32xf32, #tpu.memory_space<vmem>>, %arg4: memref<1x32xf32, #tpu.memory_space<vmem>>, %arg5: memref<1x32xf32, #tpu.memory_space<vmem>>, %arg6: memref<16x32xbf16, #tpu.memory_space<vmem>>) attributes {dimension_semantics = [#tpu.dimension_semantics<parallel>], iteration_bounds = array<i64: 1>, scalar_prefetch = 0 : i64, scratch_operands = 0 : i64, tpu.core_type = #tpu.core_type<tc>, window_params = [{transform_indices = @transform_0, window_bounds = array<i64: 16, 32>}, {pipeline_mode = #tpu.pipeline_mode<synchronous>, transform_indices = @transform_1, window_bounds = array<i64: 32, 32>}, {pipeline_mode = #tpu.pipeline_mode<synchronous>, transform_indices = @transform_2, window_bounds = array<i64: 1, 32>}, {pipeline_mode = #tpu.pipeline_mode<synchronous>, transform_indices = @transform_3, window_bounds = array<i64: 1, 32>}, {pipeline_mode = #tpu.pipeline_mode<synchronous>, transform_indices = @transform_4, window_bounds = array<i64: 1, 32>}, {transform_indices = @transform_5, window_bounds = array<i64: 16, 32>}]} {
    %c0 = arith.constant 0 : index
    %c0_0 = arith.constant 0 : index
    %0 = vector.load %arg1[%c0, %c0_0] : memref<16x32xf32, #tpu.memory_space<vmem>>, vector<16x32xf32>
    %1 = arith.truncf %0 : vector<16x32xf32> to vector<16x32xbf16>
    %c0_1 = arith.constant 0 : index
    %c0_2 = arith.constant 0 : index
    %2 = vector.load %arg2[%c0_1, %c0_2] : memref<32x32xbf16, #tpu.memory_space<vmem>>, vector<32x32xbf16>
    %cst = arith.constant dense<0.000000e+00> : vector<16x32xf32>
    %3 = tpu.matmul %1, %2, %cst {dimension_numbers = #tpu.dot_dimension_numbers<[1], [0], [0], [1], [0, 0, 1, 1], [], []>} : vector<16x32xbf16>, vector<32x32xbf16>, vector<16x32xf32> -> vector<16x32xf32>
    %c0_3 = arith.constant 0 : index
    %c0_4 = arith.constant 0 : index
    %4 = vector.load %arg3[%c0_3, %c0_4] : memref<1x32xf32, #tpu.memory_space<vmem>>, vector<1x32xf32>
    %5 = vector.broadcast %4 : vector<1x32xf32> to vector<16x32xf32>
    %6 = arith.addf %3, %5 : vector<16x32xf32>
    %cst_5 = arith.constant 5.000000e-01 : f32
    %7 = vector.broadcast %cst_5 : f32 to vector<16x32xf32>
    %8 = arith.mulf %7, %6 : vector<16x32xf32>
    %cst_6 = arith.constant 0.707106769 : f32
    %9 = vector.broadcast %cst_6 : f32 to vector<16x32xf32>
    %10 = arith.mulf %6, %9 : vector<16x32xf32>
    %11 = math.erf %10 : vector<16x32xf32>
    %cst_7 = arith.constant 1.000000e+00 : f32
    %12 = vector.broadcast %cst_7 : f32 to vector<16x32xf32>
    %13 = arith.addf %12, %11 : vector<16x32xf32>
    %14 = arith.mulf %8, %13 : vector<16x32xf32>
    %cst_8 = arith.constant dense<0.000000e+00> : vector<16xf32>
    %15 = vector.multi_reduction <add>, %14, %cst_8 [1] : vector<16x32xf32> to vector<16xf32>
    %16 = vector.shape_cast %15 : vector<16xf32> to vector<16x1xf32>
    %cst_9 = arith.constant 3.200000e+01 : f32
    %17 = vector.broadcast %cst_9 : f32 to vector<16x1xf32>
    %18 = arith.divf %16, %17 : vector<16x1xf32>
    %19 = vector.broadcast %18 : vector<16x1xf32> to vector<16x32xf32>
    %20 = arith.subf %14, %19 : vector<16x32xf32>
    %21 = arith.mulf %20, %20 : vector<16x32xf32>
    %cst_10 = arith.constant dense<0.000000e+00> : vector<16xf32>
    %22 = vector.multi_reduction <add>, %21, %cst_10 [1] : vector<16x32xf32> to vector<16xf32>
    %23 = vector.shape_cast %22 : vector<16xf32> to vector<16x1xf32>
    %cst_11 = arith.constant 3.200000e+01 : f32
    %24 = vector.broadcast %cst_11 : f32 to vector<16x1xf32>
    %25 = arith.divf %23, %24 : vector<16x1xf32>
    %26 = vector.broadcast %18 : vector<16x1xf32> to vector<16x32xf32>
    %27 = arith.subf %14, %26 : vector<16x32xf32>
    %cst_12 = arith.constant 1.000000e-07 : f32
    %28 = vector.broadcast %cst_12 : f32 to vector<16x1xf32>
    %29 = arith.addf %25, %28 : vector<16x1xf32>
    %30 = math.rsqrt %29 : vector<16x1xf32>
    %31 = vector.broadcast %30 : vector<16x1xf32> to vector<16x32xf32>
    %32 = arith.mulf %27, %31 : vector<16x32xf32>
    %c0_13 = arith.constant 0 : index
    %c0_14 = arith.constant 0 : index
    %33 = vector.load %arg4[%c0_13, %c0_14] : memref<1x32xf32, #tpu.memory_space<vmem>>, vector<1x32xf32>
    %34 = vector.broadcast %33 : vector<1x32xf32> to vector<16x32xf32>
    %35 = arith.mulf %32, %34 : vector<16x32xf32>
    %c0_15 = arith.constant 0 : index
    %c0_16 = arith.constant 0 : index
    %36 = vector.load %arg5[%c0_15, %c0_16] : memref<1x32xf32, #tpu.memory_space<vmem>>, vector<1x32xf32>
    %37 = vector.broadcast %36 : vector<1x32xf32> to vector<16x32xf32>
    %38 = arith.addf %35, %37 : vector<16x32xf32>
    %39 = arith.truncf %38 : vector<16x32xf32> to vector<16x32xbf16>
    %c0_17 = arith.constant 0 : index
    %c0_18 = arith.constant 0 : index
    %40 = vector.load %arg6[%c0_17, %c0_18] : memref<16x32xbf16, #tpu.memory_space<vmem>>, vector<16x32xbf16>
    tpu.vector_store %arg6[%c0_17, %c0_18], %39 {strides = array<i32>} : memref<16x32xbf16, #tpu.memory_space<vmem>>, vector<16x32xbf16>,
    return
  }
  func.func @transform_0(%arg0: i32) -> (i32, i32) {
    %c0_i32 = arith.constant 0 : i32
    %c0_i32_0 = arith.constant 0 : i32
    return %arg0, %c0_i32 : i32, i32
  }
  func.func @transform_1(%arg0: i32) -> (i32, i32) {
    %c0_i32 = arith.constant 0 : i32
    %c0_i32_0 = arith.constant 0 : i32
    %c0_i32_1 = arith.constant 0 : i32
    return %c0_i32, %c0_i32_0 : i32, i32
  }
  func.func @transform_2(%arg0: i32) -> (i32, i32) {
    %c0_i32 = arith.constant 0 : i32
    %c0_i32_0 = arith.constant 0 : i32
    %c0_i32_1 = arith.constant 0 : i32
    return %c0_i32, %c0_i32_0 : i32, i32
  }
  func.func @transform_3(%arg0: i32) -> (i32, i32) {
    %c0_i32 = arith.constant 0 : i32
    %c0_i32_0 = arith.constant 0 : i32
    %c0_i32_1 = arith.constant 0 : i32
    return %c0_i32, %c0_i32_0 : i32, i32
  }
  func.func @transform_4(%arg0: i32) -> (i32, i32) {
    %c0_i32 = arith.constant 0 : i32
    %c0_i32_0 = arith.constant 0 : i32
    %c0_i32_1 = arith.constant 0 : i32
    return %c0_i32, %c0_i32_0 : i32, i32
  }
  func.func @transform_5(%arg0: i32) -> (i32, i32) {
    %c0_i32 = arith.constant 0 : i32
    %c0_i32_0 = arith.constant 0 : i32
    return %arg0, %c0_i32 : i32, i32
  }
}

</mosaic_0001>

<bundles_post_ra>
// kernel: tpu_custom_call.1
= control target key start
LH: loop header
LB: loop body
LE: loop exit
PB: predicated region body
PF: predicated region fallthrough
CT: control target
= control target key end

     0   :  { %10 = vsyncpa [#allocation3], 0  ;;  %s463_s0 = inlined_call_operand.hbm [shape: f32[16,32], index: 0, kind: input, shape index: {}]   ;;  %s464_s1 = inlined_call_operand.hbm [shape: bf16[32,32], index: 1, kind: input, shape index: {}]   ;;  %s465_s2 = inlined_call_operand.vmem [shape: f32[1,32], index: 2, kind: input, shape index: {}]   ;;  %s466_s3 = inlined_call_operand.vmem [shape: f32[1,32], index: 3, kind: input, shape index: {}]   ;;  %s467_s4 = inlined_call_operand.vmem [shape: f32[1,32], index: 4, kind: input, shape index: {}]   ;;  %s468_s5 = inlined_call_operand.hbm [shape: bf16[16,32], index: 5, kind: output, shape index: {}]  }
   0x1   :  { %11 = vsyncpa [#allocation6], 0 }
   0x2   :  { %12 = vsyncpa [#allocation4], 0  ;;  %s17_s20 = sshll.u32 %s463_s0, 4  ;;  %s383_s21 = smov [#allocation2]   ;;  %s18_s20 = int_to_ptr.hbm [resolvable:$true] %s17_s20 }
   0x3   :  { %s19_s22 = sshll.u32 %s383_s21, 4  ;;  %s30_s25 = sshll.u32 %s464_s1, 4  ;;  %s20_s22 = int_to_ptr.vmem [resolvable:$true] %s19_s22  ;;  %s31_s25 = int_to_ptr.hbm [resolvable:$true] %s30_s25 }
   0x4   :  { %s384_s26 = smov 128   ;;  %s385_s27 = smov 8  }
   0x5   :  { %25 = dma.hbm_to_vmem [thread:$0]  %s18_s20, 256, %s20_s22, [#allocation3], %s384_s26, %s384_s26, %s385_s27  }
   0x6   :  { %s386_s28 = smov [#allocation5]   ;;  %s387_s30 = smov 64  }
   0x7   :  { %s32_s29 = sshll.u32 %s386_s28, 4  ;;  %s388_s6 = smov 4   ;;  %s33_s29 = int_to_ptr.vmem [resolvable:$true] %s32_s29 }
   0x8   :  { %38 = dma.hbm_to_vmem [thread:$0]  %s31_s25, 256, %s33_s29, [#allocation6], %s387_s30, %s387_s30, %s388_s6  }
   0x9   :  { %377 = dma.done.wait [#allocation3], 256  }
   0xa   :  { %378 = vsyncadd [#allocation3], 4294967040 }
   0xb   :  { %379 = dma.done.wait [#allocation6], 256  }
   0xc   :  { %380 = vsyncadd [#allocation6], 4294967040  ;;  %v283_v0 = vld [vmem:[#allocation5 + $0x8] sm:$0xff]  ;;  %v282_v1 = vld [vmem:[#allocation5] sm:$0xff]  ;;  %vm77_vm0 = vcmask 261120   ;;  %vm248_vm15 = vcmask 257024  }
   0xd   :  { %v54_v2 = vld [vmem:[#allocation2] sm:$0xff]  ;;  %87 = vmatpush.bf16.msra.mxu0 %v283_v0  ;;  %v55_v3 = vld [vmem:[#allocation2 + $0x8] sm:$0xff] }
   0xe   :  { %v56_v4 = vpack.c.bf16 %v55_v3, %v54_v2  ;;  %v292_v5 = vld [vmem:[%s465_s2] ss:$0 sm:$0xff] }
  0x11   :  { %88 = vmatpush.bf16.msra.mxu0 %v282_v1 }
  0x14   :  { %279 = vmatmul.msk.bf16.vlgmr.msra.gmra.mxu0 %vm77_vm0, %v56_v4 }
  0x91   :  { %v90_v6 = vpop.f32.mrf.mxu0 }
  0x92   :  { %v434_v7 = vadd.f32 %v292_v5, %v90_v6 }
  0x94   :  { %v97_v8 = vmul.f32 0.70710677, %v434_v7 }
  0x96   :  { %v99_v9 = vmul.f32 %v97_v8, %v97_v8 }
  0x98   :  { %v100_v10 = vmin.f32 %v99_v9, 16.0 }
  0x99   :  { %v92_v11 = vpop.f32.mrf.mxu0 }
  0x9a   :  { %v101_v12 = vmul.f32 2.1237322e-06, %v100_v10  ;;  %v437_v13 = vadd.f32 %v292_v5, %v92_v11  ;;  %v112_v14 = vmul.f32 3.8918573e-05, %v100_v10 }
  0x9c   :  { %v102_v15 = vadd.f32 0.00028619796, %v101_v12  ;;  %v440_v16 = vmul.f32 0.70710677, %v437_v13  ;;  %v113_v17 = vadd.f32 0.001143296, %v112_v14 }
  0x9e   :  { %v103_v18 = vmul.f32 %v102_v15, %v100_v10  ;;  %v139_v19 = vmul.f32 %v440_v16, %v440_v16  ;;  %v114_v20 = vmul.f32 %v113_v17, %v100_v10  ;;  %v95_v15 = vmul.f32 0.5, %v434_v7 }
  0xa0   :  { %v140_v21 = vmin.f32 %v139_v19, 16.0  ;;  %v115_v22 = vadd.f32 0.014752088, %v114_v20  ;;  %v104_v23 = vadd.f32 0.0036580483, %v103_v18 }
  0xa2   :  { %v141_v24 = vmul.f32 2.1237322e-06, %v140_v21  ;;  %v152_v25 = vmul.f32 3.8918573e-05, %v140_v21  ;;  %v116_v26 = vmul.f32 %v115_v22, %v100_v10  ;;  %v105_v30 = vmul.f32 %v104_v23, %v100_v10 }
  0xa4   :  { %v142_v27 = vadd.f32 0.00028619796, %v141_v24  ;;  %v153_v28 = vadd.f32 0.001143296, %v152_v25  ;;  %v117_v29 = vadd.f32 0.112945676, %v116_v26 }
  0xa5   :  { %v106_v37 = vadd.f32 0.05243302, %v105_v30  ;;  %v96_v25 = vmul.f32 0.5, %v437_v13 }
  0xa6   :  { %v143_v31 = vmul.f32 %v142_v27, %v140_v21  ;;  %v154_v32 = vmul.f32 %v153_v28, %v140_v21  ;;  %v118_v33 = vmul.f32 %v117_v29, %v100_v10  ;;  %v389_v28 = vmov 32.0  }
  0xa7   :  { %v107_v43 = vmul.f32 %v106_v37, %v100_v10 }
  0xa8   :  { %v155_v34 = vadd.f32 0.014752088, %v154_v32  ;;  %v144_v35 = vadd.f32 0.0036580483, %v143_v31  ;;  %v119_v36 = vadd.f32 0.4994258, %v118_v33 }
  0xa9   :  { %v108_v47 = vadd.f32 0.18741608, %v107_v43 }
  0xaa   :  { %v156_v38 = vmul.f32 %v155_v34, %v140_v21  ;;  %v120_v39 = vmul.f32 %v119_v36, %v100_v10  ;;  %v145_v41 = vmul.f32 %v144_v35, %v140_v21 }
  0xab   :  { %v109_v52 = vmul.f32 %v108_v47, %v100_v10 }
  0xac   :  { %v157_v40 = vadd.f32 0.112945676, %v156_v38  ;;  %v121_v42 = vadd.f32 1.0, %v120_v39  ;;  %v146_v46 = vadd.f32 0.05243302, %v145_v41 }
  0xad   :  { %v110_v57 = vadd.f32 1.1283791, %v109_v52 }
  0xae   :  { %v158_v44 = vmul.f32 %v157_v40, %v140_v21  ;;  %295 = vrcp.f32 %v121_v42  ;;  %v147_v51 = vmul.f32 %v146_v46, %v140_v21  ;;  %v133_v56 = vand.u32 2147483648, %v121_v42 }
  0xaf   :  { %v131_v59 = vand.u32 2147483647, %v121_v42  ;;  %vm127_vm2 = vweird.f32 %v121_v42  ;;  %v111_v1 = vmul.f32 %v110_v57, %v97_v8  ;;  %v293_v57 = vld [vmem:[%s466_s3] ss:$0 sm:$0xff]  ;;  %s390_s3 = smov [#allocation7]  }
  0xb0   :  { %v159_v45 = vadd.f32 0.4994258, %v158_v44  ;;  %v148_v55 = vadd.f32 0.18741608, %v147_v51  ;;  %v134_v63 = vor.u32 1.1754944e-38, %v133_v56  ;;  %s255_s10 = sshll.u32 %s390_s3, 4  ;;  %s256_s10 = int_to_ptr.vmem [resolvable:$true] %s255_s10 }
  0xb1   :  { %vm132_vm4 = vcmp.eq.f32.partialorder %v131_v59, 8.507059e+37 }
  0xb2   :  { %v160_v48 = vmul.f32 %v159_v45, %v140_v21  ;;  %v149_v62 = vmul.f32 %v148_v55, %v140_v21 }
  0xb4   :  { %v161_v49 = vadd.f32 1.0, %v160_v48  ;;  %v296_v50 = vpop.eup %295  ;;  %v150_v9 = vadd.f32 1.1283791, %v149_v62 }
  0xb5   :  { %v123_v53 = vmul.f32 %v296_v50, %v121_v42  ;;  %vm128_vm1 = vweird.f32 %v296_v50 }
  0xb6   :  { %297 = vrcp.f32 %v161_v49  ;;  %vm129_vm3 = vmor %vm127_vm2, %vm128_vm1  ;;  %v173_v6 = vand.u32 2147483648, %v161_v49  ;;  %v171_v11 = vand.u32 2147483647, %v161_v49  ;;  %vm167_vm6 = vweird.f32 %v161_v49 }
  0xb7   :  { %v124_v54 = vsub.f32 1.0, %v123_v53  ;;  %v151_v8 = vmul.f32 %v150_v9, %v440_v16  ;;  %299 = vrcp.f32 %v389_v28 }
  0xb8   :  { %v174_v18 = vor.u32 1.1754944e-38, %v173_v6  ;;  %vm172_vm8 = vcmp.eq.f32.partialorder %v171_v11, 8.507059e+37 }
  0xb9   :  { %v125_v58 = vmul.f32 %v296_v50, %v124_v54 }
  0xbb   :  { %v126_v61 = vadd.f32 %v296_v50, %v125_v58 }
  0xbc   :  { %v298_v60 = vpop.eup %297 }
  0xbd   :  { %v163_v0 = vmul.f32 %v298_v60, %v161_v49  ;;  %v130_v2 = vsel %vm129_vm3, %v296_v50, %v126_v61  ;;  %vm168_vm5 = vweird.f32 %v298_v60  ;;  %v300_v29 = vpop.eup %299  ;;  %v294_v61 = vld [vmem:[%s467_s4] ss:$0 sm:$0xff]  ;;  %s257_s4 = sshll.u32 %s468_s5, 4  ;;  %s258_s4 = int_to_ptr.hbm [resolvable:$true] %s257_s4 }
  0xbe   :  { %v135_v3 = vsel %vm132_vm4, %v134_v63, %v130_v2  ;;  %vm169_vm7 = vmor %vm167_vm6, %vm168_vm5  ;;  %v190_v16 = vmul.f32 32.0, %v300_v29  ;;  %vm194_vm9 = vweird.f32 %v300_v29 }
  0xbf   :  { %v164_v4 = vsub.f32 1.0, %v163_v0  ;;  %v136_v5 = vmul.f32 %v135_v3, %v111_v1 }
  0xc0   :  { %v191_v30 = vsub.f32 1.0, %v190_v16 }
  0xc1   :  { %v165_v10 = vmul.f32 %v298_v60, %v164_v4  ;;  %v280_v12 = vclamps-f32 %v136_v5, 1.0 }
  0xc2   :  { %v192_v31 = vmul.f32 %v300_v29, %v191_v30 }
  0xc3   :  { %v166_v14 = vadd.f32 %v298_v60, %v165_v10  ;;  %v179_v17 = vadd.f32 1.0, %v280_v12 }
  0xc4   :  { %v193_v32 = vadd.f32 %v300_v29, %v192_v31 }
  0xc5   :  { %v170_v19 = vsel %vm169_vm7, %v298_v60, %v166_v14  ;;  %v181_v20 = vmul.f32 %v179_v17, %v95_v15 }
  0xc6   :  { %v175_v21 = vsel %vm172_vm8, %v174_v18, %v170_v19  ;;  %v195_v33 = vsel %vm194_vm9, %v300_v29, %v193_v32 }
  0xc7   :  { %v176_v22 = vmul.f32 %v175_v21, %v151_v8  ;;  %v183_v23 = vsel %vm77_vm0, %v181_v20, 0.0 }
  0xc8   :  { %184 = vadd.xlane.f32.xlu0 %v183_v23 }
  0xc9   :  { %v281_v24 = vclamps-f32 %v176_v22, 1.0 }
  0xcb   :  { %v180_v26 = vadd.f32 1.0, %v281_v24 }
  0xcd   :  { %v182_v27 = vmul.f32 %v180_v26, %v96_v25 }
  0xcf   :  { %v186_v7 = vsel %vm77_vm0, %v182_v27, 0.0 }
  0xd0   :  { %187 = vadd.xlane.f32.xlu0 %v186_v7 }
 0x13b   :  { %v185_v34 = vpop.xlane.xlu0 %184 }
 0x13c   :  { %v196_v35 = vmul.f32 %v195_v33, %v185_v34 }
 0x13e   :  { %v198_v36 = vsub.f32 %v181_v20, %v196_v35 }
 0x140   :  { %v200_v37 = vmul.f32 %v198_v36, %v198_v36 }
 0x142   :  { %v202_v13 = vsel %vm77_vm0, %v200_v37, 0.0 }
 0x143   :  { %203 = vadd.xlane.f32.xlu1 %v202_v13  ;;  %v188_v38 = vpop.xlane.xlu0 %187 }
 0x144   :  { %v197_v39 = vmul.f32 %v195_v33, %v188_v38 }
 0x146   :  { %v199_v40 = vsub.f32 %v182_v27, %v197_v39 }
 0x148   :  { %v201_v41 = vmul.f32 %v199_v40, %v199_v40 }
 0x14a   :  { %v205_v42 = vsel %vm77_vm0, %v201_v41, 0.0 }
 0x14b   :  { %206 = vadd.xlane.f32.xlu1 %v205_v42 }
 0x1b6   :  { %v204_v43 = vpop.xlane.xlu1 %203 }
 0x1b7   :  { %v208_v44 = vmul.f32 %v204_v43, %v195_v33 }
 0x1b9   :  { %v210_v45 = vadd.f32 1e-07, %v208_v44 }
 0x1bb   :  { %301 = vrsqrt.f32 %v210_v45  ;;  %vm218_vm11 = vweird.f32 %v210_v45 }
 0x1be   :  { %v207_v46 = vpop.xlane.xlu1 %206 }
 0x1bf   :  { %v209_v47 = vmul.f32 %v207_v46, %v195_v33 }
 0x1c1   :  { %v302_v48 = vpop.eup %301  ;;  %v211_v49 = vadd.f32 1e-07, %v209_v47 }
 0x1c2   :  { %v213_v50 = vmul.f32 %v302_v48, %v210_v45  ;;  %vm219_vm10 = vweird.f32 %v302_v48 }
 0x1c3   :  { %303 = vrsqrt.f32 %v211_v49  ;;  %vm220_vm12 = vmor %vm218_vm11, %vm219_vm10  ;;  %vm228_vm14 = vweird.f32 %v211_v49 }
 0x1c4   :  { %v214_v51 = vmul.f32 %v302_v48, %v213_v50 }
 0x1c6   :  { %v215_v52 = vmul.f32 0.5, %v214_v51 }
 0x1c8   :  { %v216_v53 = vsub.f32 1.5, %v215_v52 }
 0x1c9   :  { %v304_v54 = vpop.eup %303 }
 0x1ca   :  { %v217_v55 = vmul.f32 %v302_v48, %v216_v53  ;;  %v223_v56 = vmul.f32 %v304_v54, %v211_v49  ;;  %vm229_vm13 = vweird.f32 %v304_v54 }
 0x1cb   :  { %vm230_vm0 = vmor %vm228_vm14, %vm229_vm13 }
 0x1cc   :  { %v221_v58 = vsel %vm220_vm12, %v302_v48, %v217_v55  ;;  %v224_v59 = vmul.f32 %v304_v54, %v223_v56 }
 0x1cd   :  { %v232_v60 = vmul.f32 %v221_v58, %v198_v36 }
 0x1ce   :  { %v225_v62 = vmul.f32 0.5, %v224_v59 }
 0x1cf   :  { %v238_v63 = vmul.f32 %v293_v57, %v232_v60 }
 0x1d0   :  { %v226_v0 = vsub.f32 1.5, %v225_v62 }
 0x1d1   :  { %v244_v1 = vadd.f32 %v294_v61, %v238_v63 }
 0x1d2   :  { %v227_v2 = vmul.f32 %v304_v54, %v226_v0 }
 0x1d3   :  { %v246_v3 = vpack.c.bf16 %v244_v1, %v244_v1 }
 0x1d4   :  { %v231_v4 = vsel %vm230_vm0, %v304_v54, %v227_v2 }
 0x1d5   :  { %v233_v5 = vmul.f32 %v231_v4, %v199_v40  ;;  %249 = vst.msk [vmem:[#allocation7] sm:$0xf] %vm248_vm15, %v246_v3 }
 0x1d7   :  { %v239_v6 = vmul.f32 %v293_v57, %v233_v5 }
 0x1d9   :  { %v245_v9 = vadd.f32 %v294_v61, %v239_v6 }
 0x1db   :  { %v247_v10 = vpack.c.bf16 %v245_v9, %v245_v9 }
 0x1dd   :  { %250 = vst.msk [vmem:[#allocation7 + $0x4] sm:$0xf] %vm248_vm15, %v247_v10 }
 0x1de   :  { %263 = dma.vmem_to_hbm [thread:$0]  %s256_s10, 128, %s258_s4, [#allocation4], %s387_s30, %s387_s30, %s388_s6  }
 0x1df   :  { %381 = dma.done.wait [#allocation4], 128  }
 0x1e0   :  { %382 = vsyncadd [#allocation4], 4294967168 }
 0x1e1   :  { %268 = vsyncpa [#allocation3], 1 }
 0x1e2   :  { %269 = vsyncpa [#allocation6], 1 }
 0x1e3   :  { %270 = vsyncpa [#allocation4], 1 }

// kernel: tpu_custom_call.1
= control target key start
LH: loop header
LB: loop body
LE: loop exit
PB: predicated region body
PF: predicated region fallthrough
CT: control target
= control target key end

     0   :  { %10 = vsyncpa [#allocation3], 0  ;;  %s463_s0 = inlined_call_operand.hbm [shape: f32[16,32], index: 0, kind: input, shape index: {}]   ;;  %s464_s1 = inlined_call_operand.hbm [shape: bf16[32,32], index: 1, kind: input, shape index: {}]   ;;  %s465_s2 = inlined_call_operand.vmem [shape: f32[1,32], index: 2, kind: input, shape index: {}]   ;;  %s466_s3 = inlined_call_operand.vmem [shape: f32[1,32], index: 3, kind: input, shape index: {}]   ;;  %s467_s4 = inlined_call_operand.vmem [shape: f32[1,32], index: 4, kind: input, shape index: {}]   ;;  %s468_s5 = inlined_call_operand.hbm [shape: bf16[16,32], index: 5, kind: output, shape index: {}]  }
   0x1   :  { %11 = vsyncpa [#allocation6], 0 }
   0x2   :  { %12 = vsyncpa [#allocation4], 0  ;;  %s17_s20 = sshll.u32 %s463_s0, 4  ;;  %s383_s21 = smov [#allocation2]   ;;  %s18_s20 = int_to_ptr.hbm [resolvable:$true] %s17_s20 }
   0x3   :  { %s19_s22 = sshll.u32 %s383_s21, 4  ;;  %s30_s25 = sshll.u32 %s464_s1, 4  ;;  %s20_s22 = int_to_ptr.vmem [resolvable:$true] %s19_s22  ;;  %s31_s25 = int_to_ptr.hbm [resolvable:$true] %s30_s25 }
   0x4   :  { %s384_s26 = smov 128   ;;  %s385_s27 = smov 8  }
   0x5   :  { %25 = dma.hbm_to_vmem [thread:$0]  %s18_s20, 256, %s20_s22, [#allocation3], %s384_s26, %s384_s26, %s385_s27  }
   0x6   :  { %s386_s28 = smov [#allocation5]   ;;  %s387_s30 = smov 64  }
   0x7   :  { %s32_s29 = sshll.u32 %s386_s28, 4  ;;  %s388_s6 = smov 4   ;;  %s33_s29 = int_to_ptr.vmem [resolvable:$true] %s32_s29 }
   0x8   :  { %38 = dma.hbm_to_vmem [thread:$0]  %s31_s25, 256, %s33_s29, [#allocation6], %s387_s30, %s387_s30, %s388_s6  }
   0x9   :  { %377 = dma.done.wait [#allocation3], 256  }
   0xa   :  { %378 = vsyncadd [#allocation3], 4294967040 }
   0xb   :  { %379 = dma.done.wait [#allocation6], 256  }
   0xc   :  { %380 = vsyncadd [#allocation6], 4294967040  ;;  %v283_v0 = vld [vmem:[#allocation5 + $0x8] sm:$0xff]  ;;  %v282_v1 = vld [vmem:[#allocation5] sm:$0xff]  ;;  %vm77_vm0 = vcmask 261120   ;;  %vm248_vm15 = vcmask 257024  }
   0xd   :  { %v54_v2 = vld [vmem:[#allocation2] sm:$0xff]  ;;  %87 = vmatpush.bf16.msra.mxu0 %v283_v0  ;;  %v55_v3 = vld [vmem:[#allocation2 + $0x8] sm:$0xff] }
   0xe   :  { %v56_v4 = vpack.c.bf16 %v55_v3, %v54_v2  ;;  %v292_v5 = vld [vmem:[%s465_s2] ss:$0 sm:$0xff] }
  0x11   :  { %88 = vmatpush.bf16.msra.mxu0 %v282_v1 }
  0x14   :  { %279 = vmatmul.msk.bf16.vlgmr.msra.gmra.mxu0 %vm77_vm0, %v56_v4 }
  0x91   :  { %v90_v6 = vpop.f32.mrf.mxu0 }
  0x92   :  { %v434_v7 = vadd.f32 %v292_v5, %v90_v6 }
  0x94   :  { %v97_v8 = vmul.f32 0.70710677, %v434_v7 }
  0x96   :  { %v99_v9 = vmul.f32 %v97_v8, %v97_v8 }
  0x98   :  { %v100_v10 = vmin.f32 %v99_v9, 16.0 }
  0x99   :  { %v92_v11 = vpop.f32.mrf.mxu0 }
  0x9a   :  { %v101_v12 = vmul.f32 2.1237322e-06, %v100_v10  ;;  %v437_v13 = vadd.f32 %v292_v5, %v92_v11  ;;  %v112_v14 = vmul.f32 3.8918573e-05, %v100_v10 }
  0x9c   :  { %v102_v15 = vadd.f32 0.00028619796, %v101_v12  ;;  %v440_v16 = vmul.f32 0.70710677, %v437_v13  ;;  %v113_v17 = vadd.f32 0.001143296, %v112_v14 }
  0x9e   :  { %v103_v18 = vmul.f32 %v102_v15, %v100_v10  ;;  %v139_v19 = vmul.f32 %v440_v16, %v440_v16  ;;  %v114_v20 = vmul.f32 %v113_v17, %v100_v10  ;;  %v95_v15 = vmul.f32 0.5, %v434_v7 }
  0xa0   :  { %v140_v21 = vmin.f32 %v139_v19, 16.0  ;;  %v115_v22 = vadd.f32 0.014752088, %v114_v20  ;;  %v104_v23 = vadd.f32 0.0036580483, %v103_v18 }
  0xa2   :  { %v141_v24 = vmul.f32 2.1237322e-06, %v140_v21  ;;  %v152_v25 = vmul.f32 3.8918573e-05, %v140_v21  ;;  %v116_v26 = vmul.f32 %v115_v22, %v100_v10  ;;  %v105_v30 = vmul.f32 %v104_v23, %v100_v10 }
  0xa4   :  { %v142_v27 = vadd.f32 0.00028619796, %v141_v24  ;;  %v153_v28 = vadd.f32 0.001143296, %v152_v25  ;;  %v117_v29 = vadd.f32 0.112945676, %v116_v26 }
  0xa5   :  { %v106_v37 = vadd.f32 0.05243302, %v105_v30  ;;  %v96_v25 = vmul.f32 0.5, %v437_v13 }
  0xa6   :  { %v143_v31 = vmul.f32 %v142_v27, %v140_v21  ;;  %v154_v32 = vmul.f32 %v153_v28, %v140_v21  ;;  %v118_v33 = vmul.f32 %v117_v29, %v100_v10  ;;  %v389_v28 = vmov 32.0  }
  0xa7   :  { %v107_v43 = vmul.f32 %v106_v37, %v100_v10 }
  0xa8   :  { %v155_v34 = vadd.f32 0.014752088, %v154_v32  ;;  %v144_v35 = vadd.f32 0.0036580483, %v143_v31  ;;  %v119_v36 = vadd.f32 0.4994258, %v118_v33 }
  0xa9   :  { %v108_v47 = vadd.f32 0.18741608, %v107_v43 }
  0xaa   :  { %v156_v38 = vmul.f32 %v155_v34, %v140_v21  ;;  %v120_v39 = vmul.f32 %v119_v36, %v100_v10  ;;  %v145_v41 = vmul.f32 %v144_v35, %v140_v21 }
  0xab   :  { %v109_v52 = vmul.f32 %v108_v47, %v100_v10 }
  0xac   :  { %v157_v40 = vadd.f32 0.112945676, %v156_v38  ;;  %v121_v42 = vadd.f32 1.0, %v120_v39  ;;  %v146_v46 = vadd.f32 0.05243302, %v145_v41 }
  0xad   :  { %v110_v57 = vadd.f32 1.1283791, %v109_v52 }
  0xae   :  { %v158_v44 = vmul.f32 %v157_v40, %v140_v21  ;;  %295 = vrcp.f32 %v121_v42  ;;  %v147_v51 = vmul.f32 %v146_v46, %v140_v21  ;;  %v133_v56 = vand.u32 2147483648, %v121_v42 }
  0xaf   :  { %v131_v59 = vand.u32 2147483647, %v121_v42  ;;  %vm127_vm2 = vweird.f32 %v121_v42  ;;  %v111_v1 = vmul.f32 %v110_v57, %v97_v8  ;;  %v293_v57 = vld [vmem:[%s466_s3] ss:$0 sm:$0xff]  ;;  %s390_s3 = smov [#allocation7]  }
  0xb0   :  { %v159_v45 = vadd.f32 0.4994258, %v158_v44  ;;  %v148_v55 = vadd.f32 0.18741608, %v147_v51  ;;  %v134_v63 = vor.u32 1.1754944e-38, %v133_v56  ;;  %s255_s10 = sshll.u32 %s390_s3, 4  ;;  %s256_s10 = int_to_ptr.vmem [resolvable:$true] %s255_s10 }
  0xb1   :  { %vm132_vm4 = vcmp.eq.f32.partialorder %v131_v59, 8.507059e+37 }
  0xb2   :  { %v160_v48 = vmul.f32 %v159_v45, %v140_v21  ;;  %v149_v62 = vmul.f32 %v148_v55, %v140_v21 }
  0xb4   :  { %v161_v49 = vadd.f32 1.0, %v160_v48  ;;  %v296_v50 = vpop.eup %295  ;;  %v150_v9 = vadd.f32 1.1283791, %v149_v62 }
  0xb5   :  { %v123_v53 = vmul.f32 %v296_v50, %v121_v42  ;;  %vm128_vm1 = vweird.f32 %v296_v50 }
  0xb6   :  { %297 = vrcp.f32 %v161_v49  ;;  %vm129_vm3 = vmor %vm127_vm2, %vm128_vm1  ;;  %v173_v6 = vand.u32 2147483648, %v161_v49  ;;  %v171_v11 = vand.u32 2147483647, %v161_v49  ;;  %vm167_vm6 = vweird.f32 %v161_v49 }
  0xb7   :  { %v124_v54 = vsub.f32 1.0, %v123_v53  ;;  %v151_v8 = vmul.f32 %v150_v9, %v440_v16  ;;  %299 = vrcp.f32 %v389_v28 }
  0xb8   :  { %v174_v18 = vor.u32 1.1754944e-38, %v173_v6  ;;  %vm172_vm8 = vcmp.eq.f32.partialorder %v171_v11, 8.507059e+37 }
  0xb9   :  { %v125_v58 = vmul.f32 %v296_v50, %v124_v54 }
  0xbb   :  { %v126_v61 = vadd.f32 %v296_v50, %v125_v58 }
  0xbc   :  { %v298_v60 = vpop.eup %297 }
  0xbd   :  { %v163_v0 = vmul.f32 %v298_v60, %v161_v49  ;;  %v130_v2 = vsel %vm129_vm3, %v296_v50, %v126_v61  ;;  %vm168_vm5 = vweird.f32 %v298_v60  ;;  %v300_v29 = vpop.eup %299  ;;  %v294_v61 = vld [vmem:[%s467_s4] ss:$0 sm:$0xff]  ;;  %s257_s4 = sshll.u32 %s468_s5, 4  ;;  %s258_s4 = int_to_ptr.hbm [resolvable:$true] %s257_s4 }
  0xbe   :  { %v135_v3 = vsel %vm132_vm4, %v134_v63, %v130_v2  ;;  %vm169_vm7 = vmor %vm167_vm6, %vm168_vm5  ;;  %v190_v16 = vmul.f32 32.0, %v300_v29  ;;  %vm194_vm9 = vweird.f32 %v300_v29 }
  0xbf   :  { %v164_v4 = vsub.f32 1.0, %v163_v0  ;;  %v136_v5 = vmul.f32 %v135_v3, %v111_v1 }
  0xc0   :  { %v191_v30 = vsub.f32 1.0, %v190_v16 }
  0xc1   :  { %v165_v10 = vmul.f32 %v298_v60, %v164_v4  ;;  %v280_v12 = vclamps-f32 %v136_v5, 1.0 }
  0xc2   :  { %v192_v31 = vmul.f32 %v300_v29, %v191_v30 }
  0xc3   :  { %v166_v14 = vadd.f32 %v298_v60, %v165_v10  ;;  %v179_v17 = vadd.f32 1.0, %v280_v12 }
  0xc4   :  { %v193_v32 = vadd.f32 %v300_v29, %v192_v31 }
  0xc5   :  { %v170_v19 = vsel %vm169_vm7, %v298_v60, %v166_v14  ;;  %v181_v20 = vmul.f32 %v179_v17, %v95_v15 }
  0xc6   :  { %v175_v21 = vsel %vm172_vm8, %v174_v18, %v170_v19  ;;  %v195_v33 = vsel %vm194_vm9, %v300_v29, %v193_v32 }
  0xc7   :  { %v176_v22 = vmul.f32 %v175_v21, %v151_v8  ;;  %v183_v23 = vsel %vm77_vm0, %v181_v20, 0.0 }
  0xc8   :  { %184 = vadd.xlane.f32.xlu0 %v183_v23 }
  0xc9   :  { %v281_v24 = vclamps-f32 %v176_v22, 1.0 }
  0xcb   :  { %v180_v26 = vadd.f32 1.0, %v281_v24 }
  0xcd   :  { %v182_v27 = vmul.f32 %v180_v26, %v96_v25 }
  0xcf   :  { %v186_v7 = vsel %vm77_vm0, %v182_v27, 0.0 }
  0xd0   :  { %187 = vadd.xlane.f32.xlu0 %v186_v7 }
 0x13b   :  { %v185_v34 = vpop.xlane.xlu0 %184 }
 0x13c   :  { %v196_v35 = vmul.f32 %v195_v33, %v185_v34 }
 0x13e   :  { %v198_v36 = vsub.f32 %v181_v20, %v196_v35 }
 0x140   :  { %v200_v37 = vmul.f32 %v198_v36, %v198_v36 }
 0x142   :  { %v202_v13 = vsel %vm77_vm0, %v200_v37, 0.0 }
 0x143   :  { %203 = vadd.xlane.f32.xlu1 %v202_v13  ;;  %v188_v38 = vpop.xlane.xlu0 %187 }
 0x144   :  { %v197_v39 = vmul.f32 %v195_v33, %v188_v38 }
 0x146   :  { %v199_v40 = vsub.f32 %v182_v27, %v197_v39 }
 0x148   :  { %v201_v41 = vmul.f32 %v199_v40, %v199_v40 }
 0x14a   :  { %v205_v42 = vsel %vm77_vm0, %v201_v41, 0.0 }
 0x14b   :  { %206 = vadd.xlane.f32.xlu1 %v205_v42 }
 0x1b6   :  { %v204_v43 = vpop.xlane.xlu1 %203 }
 0x1b7   :  { %v208_v44 = vmul.f32 %v204_v43, %v195_v33 }
 0x1b9   :  { %v210_v45 = vadd.f32 1e-07, %v208_v44 }
 0x1bb   :  { %301 = vrsqrt.f32 %v210_v45  ;;  %vm218_vm11 = vweird.f32 %v210_v45 }
 0x1be   :  { %v207_v46 = vpop.xlane.xlu1 %206 }
 0x1bf   :  { %v209_v47 = vmul.f32 %v207_v46, %v195_v33 }
 0x1c1   :  { %v302_v48 = vpop.eup %301  ;;  %v211_v49 = vadd.f32 1e-07, %v209_v47 }
 0x1c2   :  { %v213_v50 = vmul.f32 %v302_v48, %v210_v45  ;;  %vm219_vm10 = vweird.f32 %v302_v48 }
 0x1c3   :  { %303 = vrsqrt.f32 %v211_v49  ;;  %vm220_vm12 = vmor %vm218_vm11, %vm219_vm10  ;;  %vm228_vm14 = vweird.f32 %v211_v49 }
 0x1c4   :  { %v214_v51 = vmul.f32 %v302_v48, %v213_v50 }
 0x1c6   :  { %v215_v52 = vmul.f32 0.5, %v214_v51 }
 0x1c8   :  { %v216_v53 = vsub.f32 1.5, %v215_v52 }
 0x1c9   :  { %v304_v54 = vpop.eup %303 }
 0x1ca   :  { %v217_v55 = vmul.f32 %v302_v48, %v216_v53  ;;  %v223_v56 = vmul.f32 %v304_v54, %v211_v49  ;;  %vm229_vm13 = vweird.f32 %v304_v54 }
 0x1cb   :  { %vm230_vm0 = vmor %vm228_vm14, %vm229_vm13 }
 0x1cc   :  { %v221_v58 = vsel %vm220_vm12, %v302_v48, %v217_v55  ;;  %v224_v59 = vmul.f32 %v304_v54, %v223_v56 }
 0x1cd   :  { %v232_v60 = vmul.f32 %v221_v58, %v198_v36 }
 0x1ce   :  { %v225_v62 = vmul.f32 0.5, %v224_v59 }
 0x1cf   :  { %v238_v63 = vmul.f32 %v293_v57, %v232_v60 }
 0x1d0   :  { %v226_v0 = vsub.f32 1.5, %v225_v62 }
 0x1d1   :  { %v244_v1 = vadd.f32 %v294_v61, %v238_v63 }
 0x1d2   :  { %v227_v2 = vmul.f32 %v304_v54, %v226_v0 }
 0x1d3   :  { %v246_v3 = vpack.c.bf16 %v244_v1, %v244_v1 }
 0x1d4   :  { %v231_v4 = vsel %vm230_vm0, %v304_v54, %v227_v2 }
 0x1d5   :  { %v233_v5 = vmul.f32 %v231_v4, %v199_v40  ;;  %249 = vst.msk [vmem:[#allocation7] sm:$0xf] %vm248_vm15, %v246_v3 }
 0x1d7   :  { %v239_v6 = vmul.f32 %v293_v57, %v233_v5 }
 0x1d9   :  { %v245_v9 = vadd.f32 %v294_v61, %v239_v6 }
 0x1db   :  { %v247_v10 = vpack.c.bf16 %v245_v9, %v245_v9 }
 0x1dd   :  { %250 = vst.msk [vmem:[#allocation7 + $0x4] sm:$0xf] %vm248_vm15, %v247_v10 }
 0x1de   :  { %263 = dma.vmem_to_hbm [thread:$0]  %s256_s10, 128, %s258_s4, [#allocation4], %s387_s30, %s387_s30, %s388_s6  }
 0x1df   :  { %381 = dma.done.wait [#allocation4], 128  }
 0x1e0   :  { %382 = vsyncadd [#allocation4], 4294967168 }
 0x1e1   :  { %268 = vsyncpa [#allocation3], 1 }
 0x1e2   :  { %269 = vsyncpa [#allocation6], 1 }
 0x1e3   :  { %270 = vsyncpa [#allocation4], 1 }

</bundles_post_ra>
